<compile_context>
chip_gen: v7x
topology: tpu7x:2x2x1
jax: 0.10.0
libtpu: 0.0.40
codegen_flags: <defaults>
</compile_context>

<pallas_src>
import functools

import jax
import jax.numpy as jnp
from jax.experimental import pallas as pl
from jax.experimental.pallas import tpu as pltpu  # noqa: F401  (kept for TPU backend)


def _t2snet_kernel(x_ref, t_ref, b_ref, w_ref, out_ref, *, n_w, n_feature):
    # One fused MXU matmul, f32 accumulation:
    #   proj = [Xtu; Xtn; Xtp] @ [T_pos | T_neg | 0] + [b_pos | b_neg | 0]
    proj = jnp.dot(x_ref[...], t_ref[...],
                   preferred_element_type=jnp.float32) + b_ref[...]

    # Lane-dense (last dim = multiple of 128) full store of the slab.
    out_ref[...] = proj.astype(out_ref.dtype)

    # Gate mix, only for the Xtu rows:
    #   proj_u = neg + sigmoid(w) * (pos - neg)   (== pos*sig + neg*(1-sig))
    pos = proj[:n_w, :n_feature]
    neg = proj[:n_w, n_feature:2 * n_feature]
    sig = jax.nn.sigmoid(w_ref[...])          # (n_w, 1) broadcasts over features (EUP)
    mix = neg + sig * (pos - neg)
    out_ref[0:n_w, 0:n_feature] = mix.astype(out_ref.dtype)


def t2snet_forward(Xtu, Xtn, Xtp, T_pos, bias_pos, T_neg, bias_neg, w):
    n_w, F = Xtu.shape
    n_n = Xtn.shape[0]
    n_p = Xtp.shape[0]
    assert w.shape == (n_w, 1), "w must broadcast against Xtu rows (n_w, 1)"
    N = n_w + n_n + n_p
    F_pad = ((2 * F + 127) // 128) * 128      # lane-dense output width (>= 128)

    # Wrapper-side layout plumbing (cheap XLA ops, not kernel compute):
    x_all = jnp.concatenate([Xtu, Xtn, Xtp], axis=0)                    # (N, F)
    t_cat = jnp.zeros((F, F_pad), T_pos.dtype)
    t_cat = t_cat.at[:, :F].set(T_pos).at[:, F:2 * F].set(T_neg)        # (F, F_pad)
    b_cat = jnp.zeros((1, F_pad), bias_pos.dtype)
    b_cat = b_cat.at[:, :F].set(bias_pos).at[:, F:2 * F].set(bias_neg)  # (1, F_pad)

    full = lambda shape: pl.BlockSpec(shape, lambda: tuple(0 for _ in shape))
    kernel = functools.partial(_t2snet_kernel, n_w=n_w, n_feature=F)

    slab = pl.pallas_call(
        kernel,
        out_shape=jax.ShapeDtypeStruct((N, F_pad), jnp.float32),
        grid=(),
        in_specs=[full(x_all.shape), full(t_cat.shape),
                  full(b_cat.shape), full(w.shape)],
        out_specs=full((N, F_pad)),
    )(x_all, t_cat, b_cat, w)

    # Split the slab back into the module's three outputs.
    proj_u     = slab[:n_w, :F]                     # mixed Xtu rows, pos quadrant slot
    proj_n_neg = slab[n_w:n_w + n_n, F:2 * F]       # Xtn rows, neg quadrant
    proj_p_pos = slab[n_w + n_n:, :F]               # Xtp rows, pos quadrant
    return proj_u, proj_n_neg, proj_p_pos


def reference_forward(Xtu, Xtn, Xtp, T_pos, bias_pos, T_neg, bias_neg, w):
    proj_u_pos = Xtu @ T_pos + bias_pos
    proj_p_pos = Xtp @ T_pos + bias_pos
    proj_u_neg = Xtu @ T_neg + bias_neg
    proj_n_neg = Xtn @ T_neg + bias_neg
    sig = jax.nn.sigmoid(w)
    proj_u = proj_u_pos * sig + proj_u_neg * (1.0 - sig)
    return proj_u, proj_n_neg, proj_p_pos


if __name__ == "__main__":
    # Small shapes consistent with the module: n_feature features, n_w rows
    # in Xtu (so sigmoid(w) broadcasts), independent row counts for Xtn/Xtp.
    n_feature = 32
    n_w = 8       # rows of Xtu / rows of w
    n_n = 8       # rows of Xtn
    n_p = 8       # rows of Xtp

    key = jax.random.PRNGKey(0)
    k = jax.random.split(key, 8)

    # Parameters: torch.rand -> uniform [0, 1), deterministic here.
    T_pos    = jax.random.uniform(k[0], (n_feature, n_feature), jnp.float32)
    bias_pos = jax.random.uniform(k[1], (1, n_feature), jnp.float32)
    T_neg    = jax.random.uniform(k[2], (n_feature, n_feature), jnp.float32)
    bias_neg = jax.random.uniform(k[3], (1, n_feature), jnp.float32)
    w        = jax.random.uniform(k[4], (n_w, 1), jnp.float32)

    # Inputs.
    Xtu = jax.random.normal(k[5], (n_w, n_feature), jnp.float32)
    Xtn = jax.random.normal(k[6], (n_n, n_feature), jnp.float32)
    Xtp = jax.random.normal(k[7], (n_p, n_feature), jnp.float32)

    outs = t2snet_forward(Xtu, Xtn, Xtp, T_pos, bias_pos, T_neg, bias_neg, w)
    outs = jax.block_until_ready(outs)

    refs = reference_forward(Xtu, Xtn, Xtp, T_pos, bias_pos, T_neg, bias_neg, w)
    for o, r in zip(outs, refs):
        assert o.shape == r.shape and o.dtype == r.dtype
        assert jnp.allclose(o, r, atol=1e-4, rtol=1e-4)

    print("KERNEL_OK")
</pallas_src>

<mosaic_0001>
module attributes {stable_mosaic.version = 11 : i64} {
  func.func @_t2snet_kernel(%arg0: memref<24x32xf32, #tpu.memory_space<vmem>>, %arg1: memref<32x128xf32, #tpu.memory_space<vmem>>, %arg2: memref<1x128xf32, #tpu.memory_space<vmem>>, %arg3: memref<8x1xf32, #tpu.memory_space<vmem>>, %arg4: memref<24x128xf32, #tpu.memory_space<vmem>>) attributes {dimension_semantics = [], scalar_prefetch = 0 : i64, scratch_operands = 0 : i64, tpu.core_type = #tpu.core_type<tc>} {
    %c0 = arith.constant 0 : index
    %c0_0 = arith.constant 0 : index
    %0 = vector.load %arg0[%c0, %c0_0] : memref<24x32xf32, #tpu.memory_space<vmem>>, vector<24x32xf32>
    %c0_1 = arith.constant 0 : index
    %c0_2 = arith.constant 0 : index
    %1 = vector.load %arg1[%c0_1, %c0_2] : memref<32x128xf32, #tpu.memory_space<vmem>>, vector<32x128xf32>
    %cst = arith.constant dense<0.000000e+00> : vector<24x128xf32>
    %2 = tpu.matmul %0, %1, %cst {dimension_numbers = #tpu.dot_dimension_numbers<[1], [0], [0], [1], [0, 0, 1, 1], [], []>} : vector<24x32xf32>, vector<32x128xf32>, vector<24x128xf32> -> vector<24x128xf32>
    %c0_3 = arith.constant 0 : index
    %c0_4 = arith.constant 0 : index
    %3 = vector.load %arg2[%c0_3, %c0_4] : memref<1x128xf32, #tpu.memory_space<vmem>>, vector<1x128xf32>
    %4 = vector.broadcast %3 : vector<1x128xf32> to vector<24x128xf32>
    %5 = arith.addf %2, %4 : vector<24x128xf32>
    %c0_5 = arith.constant 0 : index
    %c0_6 = arith.constant 0 : index
    %6 = vector.load %arg4[%c0_5, %c0_6] : memref<24x128xf32, #tpu.memory_space<vmem>>, vector<24x128xf32>
    tpu.vector_store %arg4[%c0_5, %c0_6], %5 {strides = array<i32>} : memref<24x128xf32, #tpu.memory_space<vmem>>, vector<24x128xf32>,
    %7 = vector.extract_strided_slice %5 {offsets = [0, 0], sizes = [8, 32], strides = [1, 1]} : vector<24x128xf32> to vector<8x32xf32>
    %8 = vector.extract_strided_slice %5 {offsets = [0, 32], sizes = [8, 32], strides = [1, 1]} : vector<24x128xf32> to vector<8x32xf32>
    %c0_7 = arith.constant 0 : index
    %c0_8 = arith.constant 0 : index
    %9 = vector.load %arg3[%c0_7, %c0_8] : memref<8x1xf32, #tpu.memory_space<vmem>>, vector<8x1xf32>
    %10 = arith.negf %9 : vector<8x1xf32>
    %11 = math.exp %10 : vector<8x1xf32>
    %cst_9 = arith.constant 1.000000e+00 : f32
    %12 = vector.broadcast %cst_9 : f32 to vector<8x1xf32>
    %13 = arith.addf %12, %11 : vector<8x1xf32>
    %14 = arith.divf %12, %13 : vector<8x1xf32>
    %15 = arith.subf %7, %8 : vector<8x32xf32>
    %16 = vector.broadcast %14 : vector<8x1xf32> to vector<8x32xf32>
    %17 = arith.mulf %16, %15 : vector<8x32xf32>
    %18 = arith.addf %8, %17 : vector<8x32xf32>
    %c0_10 = arith.constant 0 : index
    %c0_11 = arith.constant 0 : index
    %19 = vector.load %arg4[%c0_10, %c0_11] : memref<24x128xf32, #tpu.memory_space<vmem>>, vector<8x32xf32>
    tpu.vector_store %arg4[%c0_10, %c0_11], %18 {strides = array<i32>} : memref<24x128xf32, #tpu.memory_space<vmem>>, vector<8x32xf32>,
    return
  }
}

</mosaic_0001>

<bundles_post_ra>
// kernel: tpu_custom_call.1
= control target key start
LH: loop header
LB: loop body
LE: loop exit
PB: predicated region body
PF: predicated region fallthrough
CT: control target
= control target key end

     0   :  { %9 = vsyncpa [#allocation3], 0  ;;  %s420_s0 = inlined_call_operand.hbm [shape: f32[24,32], index: 0, kind: input, shape index: {}]   ;;  %s421_s1 = inlined_call_operand.hbm [shape: f32[32,128], index: 1, kind: input, shape index: {}]   ;;  %s422_s2 = inlined_call_operand.vmem [shape: f32[1,128], index: 2, kind: input, shape index: {}]   ;;  %s423_s3 = inlined_call_operand.vmem [shape: f32[8,1], index: 3, kind: input, shape index: {}]   ;;  %s424_s4 = inlined_call_operand.hbm [shape: f32[24,128], index: 4, kind: output, shape index: {}]  }
   0x1   :  { %10 = vsyncpa [#allocation6], 0 }
   0x2   :  { %11 = vsyncpa [#allocation4], 0  ;;  %s326_s15 = smov [#allocation2]   ;;  %s254_s19 = scalar_lea.hbm %s420_s0, 384 }
   0x3   :  { %s17_s16 = sshll.u32 %s326_s15, 4  ;;  %p255_p0 = scmp.ne.s32.totalorder %s420_s0, %s254_s19  ;;  %s18_s16 = int_to_ptr.vmem [resolvable:$true] %s17_s16 }
   0x4   :  { %p258_p1 = scmp.lt.u32.totalorder %s254_s19, %s420_s0 }
   0x6   :  { %p260_p2 = pnand %p258_p1, %p255_p0 }
   0x8   :  { %263 = shalt.err (!%p260_p2)
}
   0x9   :  { %s264_s24 = scalar_lea.vmem %s18_s16, 384  ;;  %p269_p4 = scmp.lt.s32.totalorder %s18_s16, %s18_s16 }
   0xa   :  { %p265_p3 = scmp.ne.s32.totalorder %s18_s16, %s264_s24  ;;  %p270_p5 = scmp.lt.s32.totalorder %s264_s24, %s264_s24 }
   0xc   :  { %p271_p6 = por %p270_p5, %p269_p4 }
   0xe   :  { %p272_p7 = pnand %p271_p6, %p265_p3 }
  0x10   :  { %275 = shalt.err (!%p272_p7)
}
  0x11   :  { %s327_s25 = smov 128   ;;  %s328_s26 = smov 8  }
  0x12   :  { %23 = dma.hbm_to_vmem [thread:$0]  %s420_s0, 384, %s18_s16, [#allocation3], %s327_s25, %s327_s25, %s328_s26  }
  0x13   :  { %s329_s29 = smov [#allocation5]   ;;  %s276_s7 = scalar_lea.hbm %s421_s1, 512 }
  0x14   :  { %s29_s30 = sshll.u32 %s329_s29, 4  ;;  %p277_p8 = scmp.ne.s32.totalorder %s421_s1, %s276_s7  ;;  %s30_s30 = int_to_ptr.vmem [resolvable:$true] %s29_s30 }
  0x15   :  { %p280_p9 = scmp.lt.u32.totalorder %s276_s7, %s421_s1 }
  0x17   :  { %p282_p10 = pnand %p280_p9, %p277_p8 }
  0x19   :  { %285 = shalt.err (!%p282_p10)
}
  0x1a   :  { %s286_s12 = scalar_lea.vmem %s30_s30, 512  ;;  %p291_p12 = scmp.lt.s32.totalorder %s30_s30, %s30_s30 }
  0x1b   :  { %p287_p11 = scmp.ne.s32.totalorder %s30_s30, %s286_s12  ;;  %p292_p13 = scmp.lt.s32.totalorder %s286_s12, %s286_s12 }
  0x1d   :  { %p293_p0 = por %p292_p13, %p291_p12 }
  0x1f   :  { %p294_p1 = pnand %p293_p0, %p287_p11 }
  0x21   :  { %297 = shalt.err (!%p294_p1)
}
  0x22   :  { %35 = dma.hbm_to_vmem [thread:$0]  %s421_s1, 512, %s30_s30, [#allocation6], %s327_s25, %s327_s25, %s328_s26  }
  0x23   :  { %320 = dma.done.wait [#allocation3], 384  }
  0x24   :  { %321 = vsyncadd [#allocation3], 4294966912 }
  0x25   :  { %322 = dma.done.wait [#allocation6], 512  }
  0x26   :  { %323 = vsyncadd [#allocation6], 4294966784  ;;  %v330_v0 = vmov 0.0|0.0   ;;  %vm331_vm0 = vmmov 0   ;;  %v332_v1 = vmov 0.0   ;;  %v333_v2 = vmov 0  }
  0x27   :  { %228 = vmatprep.subr.bf16.mxu0 %v330_v0  ;;  %219 = vmatprep.mubr.msk.f32.mxu0 %vm331_vm0, %v332_v1  ;;  %v49_v3 = vld [vmem:[#allocation5] sm:$0xff]  ;;  %v50_v4 = vld [vmem:[#allocation5 + $0x8] sm:$0xff]  ;;  %v51_v5 = vld [vmem:[#allocation5 + $0x10] sm:$0xff]  ;;  %vm60_vm1 = vcmask 261120   ;;  %s334_s16 = smov 96   ;;  %s335_s17 = smov 32  }
  0x28   :  { %249 = vset.pattern.permute.xlu0 %v333_v2  ;;  %234 = vmatprep.subr.bf16.mxu1 %v330_v0  ;;  %v229_v6 = vpack.c.bf16 %v50_v4, %v49_v3  ;;  %v52_v7 = vld [vmem:[#allocation5 + $0x18] sm:$0xff]  ;;  %v153_v8 = vld [vmem:[%s423_s3] sm:$0xff]  ;;  %v47_v15 = vld [vmem:[#allocation2 + $0x8] sm:$0xff] }
  0x29   :  { %222 = vmatprep.mubr.msk.f32.mxu1 %vm331_vm0, %v332_v1  ;;  %v203_v9 = vmul.f32 -1.442695, %v153_v8  ;;  %v232_v10 = vpack.c.bf16 %v52_v7, %v51_v5  ;;  %v46_v11 = vld [vmem:[#allocation2] sm:$0xff]  ;;  %v48_v16 = vld [vmem:[#allocation2 + $0x10] sm:$0xff] }
  0x2a   :  { %230 = vmatpush3.bf16.msra.mxu0 %v229_v6  ;;  %236 = vmatpush3.bf16.msra.mxu1 %v229_v6  ;;  %v199_v17 = vld [vmem:[%s422_s2] ss:$0 sm:$0xff]  ;;  %s336_s2 = smov [#allocation7]  }
  0x2b   :  { %231 = vmatprep.subr.bf16.mxu0 %v330_v0  ;;  %250 = vpow2.f32 %v203_v9  ;;  %235 = vmatprep.subr.bf16.mxu1 %v330_v0  ;;  %s186_s18 = sshll.u32 %s336_s2, 4  ;;  %s187_s18 = int_to_ptr.vmem [resolvable:$true] %s186_s18 }
  0x2c   :  { %s298_s19 = scalar_lea.vmem %s187_s18, 384  ;;  %p303_p3 = scmp.lt.s32.totalorder %s187_s18, %s187_s18 }
  0x2d   :  { %p299_p2 = scmp.ne.s32.totalorder %s187_s18, %s298_s19  ;;  %p304_p4 = scmp.lt.s32.totalorder %s298_s19, %s298_s19 }
  0x2e   :  { %233 = vmatpush3.bf16.msra.mxu0 %v232_v10  ;;  %237 = vmatpush3.bf16.msra.mxu1 %v232_v10 }
  0x2f   :  { %p305_p5 = por %p304_p4, %p303_p3 }
  0x31   :  { %220 = vmatmul.mubr.msk.f32.vlgmr.msra.gmra.mrb[0].mxu0 %vm60_vm1, %v46_v11  ;;  %223 = vmatmul.mubr.msk.f32.vlgmr.msra.gmra.mrb[0].mxu1 %vm60_vm1, %v47_v15  ;;  %p306_p6 = pnand %p305_p5, %p299_p2 }
  0x32   :  { %225 = vmatprep.mubr.msk.f32.mxu1 %vm331_vm0, %v332_v1 }
  0x35   :  { %v251_v12 = vpop.eup %250  ;;  %226 = vmatmul.mubr.msk.f32.gmra.mrb[2].mxu1 %vm60_vm1, %v48_v16 }
  0x36   :  { %v157_v13 = vadd.f32 1.0, %v251_v12 }
  0x38   :  { %252 = vrcp.f32 %v157_v13 }
  0x42   :  { %v253_v14 = vpop.eup %252 }
  0x43   :  { %167 = vperm.xlu0 %249, %v253_v14  }
  0xc2   :  { %v168_v21 = vpop.permute.xlu0 %167 }
 0x104   :  { %v136_v18 = vpop.f32.mrb[0].mxu0  ;;  %v141_v25 = vpop.f32.mrb[0].mxu1 }
 0x105   :  { %v137_v19 = vadd.f32 %v199_v17, %v136_v18  ;;  %v221_v20 = vpop.f32.mrb[1].mxu0  ;;  %v142_v26 = vadd.f32 %v199_v17, %v141_v25  ;;  %v224_v27 = vpop.f32.mrb[1].mxu1 }
 0x107   :  { %150 = vst [vmem:[#allocation7] sm:$0xff] %v137_v19  ;;  %161 = vrot.lane.b32.xlu0 %v137_v19, %s334_s16  ;;  %151 = vst [vmem:[#allocation7 + $0x8] sm:$0xff] %v142_v26 }
 0x108   :  { %v146_v28 = vpop.f32.mrb[2].mxu1 }
 0x109   :  { %v147_v29 = vadd.f32 %v199_v17, %v146_v28  ;;  %v227_v30 = vpop.f32.mrb[3].mxu1 }
 0x10b   :  { %152 = vst [vmem:[#allocation7 + $0x10] sm:$0xff] %v147_v29 }
 0x179   :  { %v162_v22 = vpop.permute.xlu0 %161 }
 0x17a   :  { %v164_v23 = vsub.f32 %v137_v19, %v162_v22 }
 0x17c   :  { %v170_v24 = vmul.f32 %v168_v21, %v164_v23 }
 0x17e   :  { %172 = vrot.lane.b32.xlu1 %v170_v24, %s335_s17 }
 0x1f0   :  { %v173_v31 = vpop.permute.xlu1 %172 }
 0x1f1   :  { %v175_v32 = vadd.f32 %v173_v31, %v137_v19 }
 0x1f3   :  { %177 = vrot.lane.b32.xlu1 %v175_v32, %s334_s16 }
 0x265   :  { %v178_v33 = vpop.permute.xlu1 %177 }
 0x266   :  { %180 = vst.msk [vmem:[#allocation7] sm:$0xff] %vm60_vm1, %v178_v33 }
 0x267   :  { %309 = shalt.err (!%p306_p6)
}
 0x268   :  { %s310_s22 = scalar_lea.hbm %s424_s4, 384 }
 0x269   :  { %p311_p7 = scmp.ne.s32.totalorder %s424_s4, %s310_s22  ;;  %p314_p8 = scmp.lt.u32.totalorder %s310_s22, %s424_s4 }
 0x26b   :  { %p316_p9 = pnand %p314_p8, %p311_p7 }
 0x26d   :  { %319 = shalt.err (!%p316_p9)
}
 0x26e   :  { %192 = dma.vmem_to_hbm [thread:$0]  %s187_s18, 384, %s424_s4, [#allocation4], %s327_s25, %s327_s25, %s328_s26  }
 0x26f   :  { %324 = dma.done.wait [#allocation4], 384  }
 0x270   :  { %325 = vsyncadd [#allocation4], 4294966912 }
 0x271   :  { %196 = vsyncpa [#allocation3], 1 }
 0x272   :  { %197 = vsyncpa [#allocation6], 1 }
 0x273   :  { %198 = vsyncpa [#allocation4], 1 }

</bundles_post_ra>
